<compile_context>
chip_gen: v6e
topology: v6e:2x2x1
jax: 0.10.0
libtpu: 0.0.40
codegen_flags: <defaults>
</compile_context>

<pallas_src>
import jax
import jax.numpy as jnp
from jax.experimental import pallas as pl
from jax.experimental.pallas import tpu as pltpu


def _focus_kernel(w_ref, b_ref, x_ref, o_ref):
    # w_ref: (c2, 4C)      1x1 conv weight, BN scale folded in (VMEM-resident, bf16/f32)
    # b_ref: (c2, 1)       folded BN bias, f32                  (VMEM-resident)
    # x_ref: (1, 4C, tp)   space-to-depth activations, pixels on lanes
    # o_ref: (1, c2, tp)   lane-dense output tile
    acc = jnp.dot(w_ref[...], x_ref[0],
                  preferred_element_type=jnp.float32)      # (c2, tp) on the MXU, f32 acc
    y = acc + b_ref[...]                                    # f32 epilogue (v5e-safe)
    o_ref[0] = (y * jax.nn.sigmoid(y)).astype(o_ref.dtype)  # SiLU, cast only at the store


def _pick_pixel_tile(P, per_pixel_bytes, max_pixel_tile, vmem_budget_bytes, batch):
    """Pick the pixel (lane) tile width.

    Multiple of 128 (lane-dense, unmasked stores), capped by a double-buffered
    VMEM budget and max_pixel_tile, preferring an exact divisor of P (no masked
    tail) and guaranteeing >= 2 pixel tiles when batch == 1 so both v7x
    TensorCores get work.  Irregular P falls back to a cdiv grid with a masked
    tail block instead of one monolithic block.
    """
    if P <= 128:
        return P                                          # full axis; legal block shape
    cap = min(max_pixel_tile, vmem_budget_bytes // per_pixel_bytes)
    cap = max(128, cap - cap % 128)
    if batch == 1:                                        # keep both v7x cores busy
        half = max(128, (P // 2) - (P // 2) % 128)
        cap = min(cap, half)
    cap = min(cap, max(128, P - P % 128))
    if P % 128 == 0:
        t = cap
        while t >= 128 and P % t != 0:
            t -= 128
        if t >= max(128, cap // 2):
            return t                                      # even split, no masked tail
    return cap                                            # cdiv grid; tail block masked


def focus_forward(x, conv_w, bn_gamma, bn_beta, bn_mean, bn_var,
                  eps=1e-5,
                  compute_dtype=jnp.bfloat16,
                  out_dtype=None,
                  max_pixel_tile=32768,
                  vmem_budget_bytes=12 * 1024 * 1024):
    """Focus.forward: cat of 4 strided slices along channels, then Conv(1x1)+BN+SiLU.

    x:       (B, C, H, W)    float32, NCHW
    conv_w:  (c2, 4C, 1, 1)  torch-style OIHW weight of the 1x1 conv (bias=False)
    returns: (B, c2, H//2, W//2) NCHW, dtype out_dtype (default: x.dtype)
    """
    B, C, H, W = x.shape
    c2 = conv_w.shape[0]
    H2, W2 = H // 2, W // 2
    P = H2 * W2
    out_dtype = x.dtype if out_dtype is None else jnp.dtype(out_dtype)

    # --- space-to-depth (torch.cat order), fused with the compute-dtype cast so the
    #     materialized s2d tensor is already bf16 (half the extra HBM pass). ---------
    s2d = jnp.concatenate(
        (x[..., ::2, ::2].astype(compute_dtype),
         x[..., 1::2, ::2].astype(compute_dtype),
         x[..., ::2, 1::2].astype(compute_dtype),
         x[..., 1::2, 1::2].astype(compute_dtype)),
        axis=1,
    )                                        # (B, 4C, H2, W2)
    x_mat = s2d.reshape(B, 4 * C, P)         # pixels on the last (lane) axis, no transpose

    # --- fold BN(eval): w_eff = scale * W , bias = beta - mean * scale (exact, in f32) ---
    scale = (bn_gamma / jnp.sqrt(bn_var + eps)).astype(jnp.float32)             # (c2,)
    w_eff = (conv_w.reshape(c2, 4 * C).astype(jnp.float32)
             * scale[:, None]).astype(compute_dtype)                            # (c2, 4C)
    bias = (bn_beta.astype(jnp.float32)
            - bn_mean.astype(jnp.float32) * scale).reshape(c2, 1)               # (c2, 1) f32

    act_bytes = jnp.dtype(compute_dtype).itemsize
    out_bytes = jnp.dtype(out_dtype).itemsize
    # Double-buffered bytes per pixel of lane width (activation block + output block).
    per_pixel_bytes = 2 * (4 * C * act_bytes + c2 * out_bytes)
    tp = _pick_pixel_tile(P, per_pixel_bytes, max_pixel_tile, vmem_budget_bytes, B)
    n_ptiles = pl.cdiv(P, tp)
    grid = (B, n_ptiles)

    cost = pl.CostEstimate(
        flops=2 * B * P * (4 * C) * c2,
        transcendentals=B * P * c2,
        bytes_accessed=(x_mat.size * act_bytes + w_eff.size * act_bytes
                        + bias.size * 4 + B * c2 * P * out_bytes),
    )

    out_mat = pl.pallas_call(
        _focus_kernel,
        out_shape=jax.ShapeDtypeStruct((B, c2, P), out_dtype),
        grid_spec=pltpu.PrefetchScalarGridSpec(
            num_scalar_prefetch=0,
            grid=grid,
            in_specs=[
                pl.BlockSpec((c2, 4 * C), lambda b, p: (0, 0)),        # weight, VMEM-resident
                pl.BlockSpec((c2, 1), lambda b, p: (0, 0)),            # bias,   VMEM-resident
                pl.BlockSpec((1, 4 * C, tp), lambda b, p: (b, 0, p)),  # activations
            ],
            out_specs=pl.BlockSpec((1, c2, tp), lambda b, p: (b, 0, p)),
        ),
        compiler_params=pltpu.CompilerParams(
            dimension_semantics=("parallel", "parallel"),   # megacore-shardable
            allow_input_fusion=[False, False, True],        # let XLA fuse the s2d producer
        ),
        cost_estimate=cost,
    )(w_eff, bias, x_mat)

    # (B, c2, P) -> (B, c2, H2, W2): already NCHW, no transpose needed.
    return out_mat.reshape(B, c2, H2, W2)


def _reference(x, conv_w, bn_gamma, bn_beta, bn_mean, bn_var, eps=1e-5):
    s2d = jnp.concatenate(
        (x[..., ::2, ::2], x[..., 1::2, ::2], x[..., ::2, 1::2], x[..., 1::2, 1::2]),
        axis=1,
    )
    y = jax.lax.conv_general_dilated(
        s2d, conv_w, window_strides=(1, 1), padding="VALID",
        dimension_numbers=("NCHW", "OIHW", "NCHW"),
    )
    scale = bn_gamma / jnp.sqrt(bn_var + eps)
    y = y * scale[None, :, None, None] + (bn_beta - bn_mean * scale)[None, :, None, None]
    return y * jax.nn.sigmoid(y)


def _make_params(key, C, c2):
    k_w, k_g, k_b, k_m, k_v = jax.random.split(key, 5)
    conv_w = jax.random.normal(k_w, (c2, 4 * C, 1, 1), dtype=jnp.float32) * 0.1
    bn_gamma = 1.0 + 0.1 * jax.random.normal(k_g, (c2,), dtype=jnp.float32)
    bn_beta = 0.1 * jax.random.normal(k_b, (c2,), dtype=jnp.float32)
    bn_mean = 0.1 * jax.random.normal(k_m, (c2,), dtype=jnp.float32)
    bn_var = jnp.abs(1.0 + 0.1 * jax.random.normal(k_v, (c2,), dtype=jnp.float32))
    return conv_w, bn_gamma, bn_beta, bn_mean, bn_var


def _check(out, ref, atol, rtol, name):
    out_f = out.astype(jnp.float32)
    ok = bool(jnp.allclose(out_f, ref, atol=atol, rtol=rtol))
    err = float(jnp.max(jnp.abs(out_f - ref)))
    assert ok, f"{name}: max abs err {err}"


if __name__ == "__main__":
    key = jax.random.PRNGKey(0)
    k_p1, k_x1, k_x2, k_p3, k_x3 = jax.random.split(key, 5)

    # ---- Case 1: small shapes, f32 compute path (tight check of the structure). ----
    B, C, H, W, c2 = 2, 4, 16, 16, 32
    params = _make_params(k_p1, C, c2)
    x = jax.random.normal(k_x1, (B, C, H, W), dtype=jnp.float32)
    out = focus_forward(x, *params, compute_dtype=jnp.float32)
    jax.block_until_ready(out)
    assert out.shape == (B, c2, H // 2, W // 2), out.shape
    _check(out, _reference(x, *params), 1e-4, 1e-4, "case1")

    # ---- Case 2: bf16 compute, multi-step pixel grid (max_pixel_tile=128 only to force
    #      >1 pixel tile at this tiny test size; real defaults pick much larger tiles). ----
    Hl, Wl = 32, 32
    x2 = jax.random.normal(k_x2, (B, C, Hl, Wl), dtype=jnp.float32)
    out2 = focus_forward(x2, *params, max_pixel_tile=128)   # P=256 -> grid (B, 2)
    jax.block_until_ready(out2)
    assert out2.shape == (B, c2, Hl // 2, Wl // 2), out2.shape
    _check(out2, _reference(x2, *params), 2e-2, 2e-2, "case2")

    # ---- Case 3: batch=1, irregular P (masked tail block), bf16 in AND bf16 out,
    #      exercises the >=2-pixel-tile-per-batch path for v7x megacore. ----
    B3, C3, H3, W3, c23 = 1, 3, 34, 34, 32
    params3 = _make_params(k_p3, C3, c23)
    x3 = jax.random.normal(k_x3, (B3, C3, H3, W3), dtype=jnp.float32)
    out3 = focus_forward(x3, *params3, out_dtype=jnp.bfloat16)   # P=289 -> tp=128, grid (1, 3)
    jax.block_until_ready(out3)
    assert out3.shape == (B3, c23, H3 // 2, W3 // 2), out3.shape
    assert out3.dtype == jnp.bfloat16
    _check(out3, _reference(x3, *params3), 3e-2, 3e-2, "case3")

    print("KERNEL_OK")
</pallas_src>

<mosaic_0001>
module attributes {stable_mosaic.version = 11 : i64} {
  func.func @_focus_kernel(%arg0: i32, %arg1: i32, %arg2: memref<32x16xf32, #tpu.memory_space<vmem>>, %arg3: memref<32x1xf32, #tpu.memory_space<vmem>>, %arg4: memref<1x16x64xf32, #tpu.memory_space<vmem>>, %arg5: memref<1x32x64xf32, #tpu.memory_space<vmem>>) attributes {dimension_semantics = [#tpu.dimension_semantics<parallel>, #tpu.dimension_semantics<parallel>], iteration_bounds = array<i64: 2, 1>, scalar_prefetch = 0 : i64, scratch_operands = 0 : i64, tpu.core_type = #tpu.core_type<tc>, window_params = [{pipeline_mode = #tpu.pipeline_mode<synchronous>, transform_indices = @transform_0, window_bounds = array<i64: 32, 16>}, {pipeline_mode = #tpu.pipeline_mode<synchronous>, transform_indices = @transform_1, window_bounds = array<i64: 32, 1>}, {transform_indices = @transform_2, window_bounds = array<i64: 1, 16, 64>}, {transform_indices = @transform_3, window_bounds = array<i64: 1, 32, 64>}]} {
    %c0 = arith.constant 0 : index
    %c0_0 = arith.constant 0 : index
    %0 = vector.load %arg2[%c0, %c0_0] : memref<32x16xf32, #tpu.memory_space<vmem>>, vector<32x16xf32>
    %c0_1 = arith.constant 0 : index
    %c0_2 = arith.constant 0 : index
    %c0_3 = arith.constant 0 : index
    %1 = vector.load %arg4[%c0_1, %c0_2, %c0_3] : memref<1x16x64xf32, #tpu.memory_space<vmem>>, vector<1x16x64xf32>
    %2 = vector.shape_cast %1 : vector<1x16x64xf32> to vector<16x64xf32>
    %cst = arith.constant dense<0.000000e+00> : vector<32x64xf32>
    %3 = tpu.matmul %0, %2, %cst {dimension_numbers = #tpu.dot_dimension_numbers<[1], [0], [0], [1], [0, 0, 1, 1], [], []>} : vector<32x16xf32>, vector<16x64xf32>, vector<32x64xf32> -> vector<32x64xf32>
    %c0_4 = arith.constant 0 : index
    %c0_5 = arith.constant 0 : index
    %4 = vector.load %arg3[%c0_4, %c0_5] : memref<32x1xf32, #tpu.memory_space<vmem>>, vector<32x1xf32>
    %5 = vector.broadcast %4 : vector<32x1xf32> to vector<32x64xf32>
    %6 = arith.addf %3, %5 : vector<32x64xf32>
    %7 = arith.negf %6 : vector<32x64xf32>
    %8 = math.exp %7 : vector<32x64xf32>
    %cst_6 = arith.constant 1.000000e+00 : f32
    %9 = vector.broadcast %cst_6 : f32 to vector<32x64xf32>
    %10 = arith.addf %9, %8 : vector<32x64xf32>
    %11 = arith.divf %9, %10 : vector<32x64xf32>
    %12 = arith.mulf %6, %11 : vector<32x64xf32>
    %c0_7 = arith.constant 0 : index
    %c0_8 = arith.constant 0 : index
    %c0_9 = arith.constant 0 : index
    %13 = vector.load %arg5[%c0_7, %c0_8, %c0_9] : memref<1x32x64xf32, #tpu.memory_space<vmem>>, vector<1x32x64xf32>
    %14 = vector.shape_cast %13 : vector<1x32x64xf32> to vector<32x64xf32>
    %15 = vector.shape_cast %12 : vector<32x64xf32> to vector<1x32x64xf32>
    tpu.vector_store %arg5[%c0_7, %c0_8, %c0_9], %15 {strides = array<i32>} : memref<1x32x64xf32, #tpu.memory_space<vmem>>, vector<1x32x64xf32>,
    return
  }
  func.func @transform_0(%arg0: i32, %arg1: i32) -> (i32, i32) {
    %c0_i32 = arith.constant 0 : i32
    %c0_i32_0 = arith.constant 0 : i32
    %c0_i32_1 = arith.constant 0 : i32
    return %c0_i32, %c0_i32_0 : i32, i32
  }
  func.func @transform_1(%arg0: i32, %arg1: i32) -> (i32, i32) {
    %c0_i32 = arith.constant 0 : i32
    %c0_i32_0 = arith.constant 0 : i32
    %c0_i32_1 = arith.constant 0 : i32
    return %c0_i32, %c0_i32_0 : i32, i32
  }
  func.func @transform_2(%arg0: i32, %arg1: i32) -> (i32, i32, i32) {
    %c0_i32 = arith.constant 0 : i32
    %c0_i32_0 = arith.constant 0 : i32
    return %arg0, %c0_i32, %arg1 : i32, i32, i32
  }
  func.func @transform_3(%arg0: i32, %arg1: i32) -> (i32, i32, i32) {
    %c0_i32 = arith.constant 0 : i32
    %c0_i32_0 = arith.constant 0 : i32
    return %arg0, %c0_i32, %arg1 : i32, i32, i32
  }
}

</mosaic_0001>

<bundles_post_ra>
// kernel: tpu_custom_call.1
= control target key start
LH: loop header
LB: loop body
LE: loop exit
PB: predicated region body
PF: predicated region fallthrough
CT: control target
= control target key end

     0   :  { %8 = vsyncpa [#allocation3], 0  ;;  %s815_s0 = inlined_call_operand.vmem [shape: f32[32,16], index: 0, kind: input, shape index: {}]   ;;  %s816_s1 = inlined_call_operand.vmem [shape: f32[32,1], index: 1, kind: input, shape index: {}]   ;;  %s817_s2 = inlined_call_operand.vmem [shape: f32[2,16,64], index: 2, kind: input, shape index: {}]   ;;  %s818_s3 = inlined_call_operand.hbm [shape: f32[2,32,64], index: 3, kind: output, shape index: {}]  }
   0x1   :  { %10 = vsyncpa [#allocation3 + $0x1], 0  ;;  %s669_s12 = smov 0   ;;  %s671_s13 = smov 0  }
   0x2   :  { %s673_s14 = smov 0   ;;  %s675_s15 = smov 0  }
   0x3   :  { %s677_s16 = smov 0   ;;  %s679_s17 = smov 0  }
   0x4 LB: > { %s448_s18 = sadd.s32 4294967295, %s643_s17   ;;  %s449_s19 = sadd.s32 4294967294, %s643_s17   ;;  %s643_s17 = sphi %s679_s17, %s16_s17   ;;  %s639_s16 = sphi %s677_s16, %s825_s16   ;;  %s635_s15 = sphi %s675_s15, %s824_s15   ;;  %s631_s14 = sphi %s673_s14, %s823_s14   ;;  %s627_s13 = sphi %s671_s13, %s822_s13   ;;  %s623_s12 = sphi %s669_s12, %s821_s12  }
   0x5   : > { %s28_s20 = sadd.s32 1, %s639_s16  ;;  %s107_s21 = sadd.s32 1, %s631_s14 }
   0x6   : > { %p30_p0 = scmp.ge.s32.totalorder %s28_s20, 2  ;;  %p117_p1 = scmp.ne.s32.totalorder %s631_s14, %s627_s13 }
   0x7   : > { %p118_p2 = scmp.eq.s32.totalorder %s448_s18, 1  ;;  %p123_p3 = scmp.ne.s32.totalorder %s627_s13, %s623_s12 }
   0x8   : > { %s827_s20 = smov (%p30_p0, %s28_s20), 0  ;;  %p124_p5 = scmp.eq.s32.totalorder %s449_s19, 1 }
   0x9   : > { %p709_p4 = por %p118_p2, %p117_p1  ;;  %s102_s23 = ssub.s32 %s639_s16, %s827_s20 }
   0xa   : > { %p452_p6 = scmp.ge.s32.totalorder %s643_s17, 1  ;;  %p105_p7 = scmp.eq.s32.totalorder %s102_s23, 0 }
   0xb   : > { %p716_p8 = por %p124_p5, %p123_p3  ;;  %p159_p9 = scmp.lt.s32.totalorder %s643_s17, 3 }
   0xc   : > { %s722_s25 = scalar_select %p105_p7, %s631_s14, %s107_s21  }
   0xd   : > { %p160_p10 = pnand %p452_p6, %p159_p9 }
   0xe   : > { %p186_p11 = scmp.lt.s32.totalorder (!%p160_p10), %s635_s15, 1  ;;  %s183_s30 = sand.u32 (!%p160_p10), 1, %s627_s13  }
   0xf   : > { %163 = sbr.rel (%p160_p10) target bundleno = 275 (0x113), region = 32  ;;  %s453_s4 = sshll.u32 (!%p160_p10), %s183_s30, 5 }
  0x10   : > { %s185_s5 = scalar_lea.vmem (!%p160_p10), [#allocation2], %s453_s4  ;;  %s646_s18 = smov (!%p160_p10), [#allocation2]  }
  0x11   : > { %s370_s6 = sshll.u32 (!%p160_p10), %s185_s5, 4  ;;  %s571_s19 = sshll.u32 (!%p160_p10), %s646_s18, 4  ;;  %s765_s6 = int_to_ptr.vmem [resolvable:$true] %s370_s6  ;;  %s572_s19 = int_to_ptr.vmem [resolvable:$false] %s571_s19 }
  0x12   : > { %s573_s21 = scalar_lea.vmem (!%p160_p10), %s572_s19, 1024  ;;  %p574_p1 = scmp.lt.s32.totalorder (!%p160_p10), %s765_s6, %s572_s19 }
  0x14   : > { %v194_v0 = vld [vmem:[%s815_s0] sm:$0xff]  ;;  %vm224_vm0 = vcmask 130048   ;;  %v196_v1 = vld [vmem:[%s815_s0 + $0x10] sm:$0xff]  ;;  %s187_s7 = scalar_select %p186_p11, %s635_s15, 1  ;;  %v645_v4 = vmov 0   ;;  %v195_v7 = vld [vmem:[%s815_s0 + $0x8] sm:$0xff] }
  0x15   : > { %481 = vmatprep.mubr.msk.f32.mxu0 %vm224_vm0, %v194_v0  ;;  %484 = vmatprep.mubr.msk.f32.mxu1 %vm224_vm0, %v196_v1  ;;  %v202_v2 = vld [vmem:[%s816_s1 + $0x10] sm:$0xff]  ;;  %v200_v3 = vld [vmem:[%s816_s1] sm:$0xff]  ;;  %v197_v8 = vld [vmem:[%s815_s0 + $0x18] sm:$0xff]  ;;  %vm350_vm1 = vcmask 523264  }
  0x16   : > { %550 = vset.pattern.permute.xlu1 %v645_v4  ;;  %549 = vset.pattern.permute.xlu0 %v645_v4  ;;  %s469_s8 = sshll.u32 %s187_s7, 4  ;;  %v203_v9 = vld [vmem:[%s816_s1 + $0x18] sm:$0xff]  ;;  %v201_v10 = vld [vmem:[%s816_s1 + $0x8] sm:$0xff]  ;;  %s470_s7 = sshll.u32 %s635_s15, 9 }
  0x17   : > { %216 = vperm.xlu1 %550, %v202_v2   ;;  %206 = vperm.xlu0 %549, %v200_v3   ;;  %s193_s11 = scalar_lea.vmem %s817_s2, %s469_s8  ;;  %s763_s10 = scalar_lea.hbm %s818_s3, %s470_s7 }
  0x18   : > { %v199_v5 = vld [vmem:[%s193_s11 + $0x8] sm:$0xff]  ;;  %v198_v6 = vld [vmem:[%s193_s11] sm:$0xff]  ;;  %s770_s15 = scalar_lea.sflag [#allocation3], %s183_s30  ;;  %s567_s11 = scalar_lea.vmem %s765_s6, 512 }
  0x19   : > { %477 = vmatprep.subr.mxu0 %v199_v5  ;;  %487 = vmatprep.subr.mxu1 %v199_v5  ;;  %p568_p12 = scmp.ne.s32.totalorder %s765_s6, %s567_s11  ;;  %p575_p2 = scmp.lt.s32.totalorder %s573_s21, %s567_s11 }
  0x1a   : > { %478 = vmatpush3.msra.mxu0 %v199_v5  ;;  %489 = vmatpush3.msra.mxu1 %v199_v5 }
  0x1b   : > { %479 = vmatprep.subr.mxu0 %v198_v6  ;;  %488 = vmatprep.subr.mxu1 %v198_v6  ;;  %p569_p13 = pnand %p568_p12, %p709_p4  ;;  %p576_p3 = por %p575_p2, %p574_p1 }
  0x1c   : > { %480 = vmatpush3.msra.mxu0 %v198_v6  ;;  %490 = vmatpush3.msra.mxu1 %v198_v6 }
  0x1d   : > { %482 = vmatmul.mubr.msk.f32.vlgmr.msra.gmra.mxu0 %vm224_vm0, %v195_v7  ;;  %485 = vmatmul.mubr.msk.f32.vlgmr.msra.gmra.mxu1 %vm224_vm0, %v197_v8  ;;  %p570_p0 = pneg %p569_p13 }
  0x1e   : > { %221 = vperm.xlu1 %550, %v203_v9   ;;  %211 = vperm.xlu0 %549, %v201_v10  }
  0x1f   : > { %p577_p5 = pnand %p576_p3, %p570_p0 }
  0x92   : > { %v217_v11 = vpop.permute.xlu1 %216  ;;  %v207_v12 = vpop.permute.xlu0 %206 }
  0x99   : > { %v222_v13 = vpop.permute.xlu1 %221  ;;  %v212_v14 = vpop.permute.xlu0 %211 }
  0xdd   : > { %v483_v15 = vpop.f32.mrf.mxu0  ;;  %v486_v16 = vpop.f32.mrf.mxu1 }
  0xde   : > { %v309_v17 = vadd.f32 %v483_v15, %v212_v14  ;;  %v319_v18 = vadd.f32 %v486_v16, %v222_v13 }
  0xdf   : > { %v303_v19 = vpop.f32.mrf.mxu0  ;;  %v313_v20 = vpop.f32.mrf.mxu1 }
  0xe0   : > { %v461_v21 = vmul.f32 -1.442695, %v309_v17  ;;  %v463_v22 = vmul.f32 -1.442695, %v319_v18  ;;  %v304_v23 = vadd.f32 %v303_v19, %v207_v12  ;;  %v314_v24 = vadd.f32 %v313_v20, %v217_v11 }
  0xe2   : > { %551 = vpow2.f32 %v461_v21  ;;  %v460_v25 = vmul.f32 -1.442695, %v304_v23  ;;  %v462_v26 = vmul.f32 -1.442695, %v314_v24 }
  0xe3   : > { %553 = vpow2.f32 %v463_v22 }
  0xe4   : > { %555 = vpow2.f32 %v460_v25 }
  0xe5   : > { %557 = vpow2.f32 %v462_v26 }
  0xef   : > { %v552_v27 = vpop.eup %551 }
  0xf0   : > { %v554_v28 = vpop.eup %553  ;;  %v335_v29 = vadd.f32 1.0, %v552_v27 }
  0xf1   : > { %v556_v30 = vpop.eup %555  ;;  %v337_v31 = vadd.f32 1.0, %v554_v28 }
  0xf2   : > { %v558_v32 = vpop.eup %557  ;;  %559 = vrcp.f32 %v335_v29  ;;  %v334_v33 = vadd.f32 1.0, %v556_v30 }
  0xf3   : > { %561 = vrcp.f32 %v337_v31  ;;  %v336_v34 = vadd.f32 1.0, %v558_v32 }
  0xf4   : > { %563 = vrcp.f32 %v334_v33 }
  0xf5   : > { %565 = vrcp.f32 %v336_v34 }
  0xff   : > { %v560_v35 = vpop.eup %559 }
 0x100   : > { %v562_v36 = vpop.eup %561  ;;  %v347_v37 = vmul.f32 %v560_v35, %v309_v17 }
 0x101   : > { %v564_v38 = vpop.eup %563  ;;  %v349_v39 = vmul.f32 %v562_v36, %v319_v18 }
 0x102   : > { %v566_v40 = vpop.eup %565  ;;  %352 = vst.msk [vmem:[%s185_s5 + $0x8] sm:$0xff] %vm350_vm1, %v347_v37  ;;  %v346_v41 = vmul.f32 %v564_v38, %v304_v23 }
 0x103   : > { %354 = vst.msk [vmem:[%s185_s5 + $0x18] sm:$0xff] %vm350_vm1, %v349_v39  ;;  %v348_v42 = vmul.f32 %v566_v40, %v314_v24 }
 0x104   : > { %351 = vst.msk [vmem:[%s185_s5] sm:$0xff] %vm350_vm1, %v346_v41 }
 0x105   : > { %353 = vst.msk [vmem:[%s185_s5 + $0x10] sm:$0xff] %vm350_vm1, %v348_v42 }
 0x106   : > { %580 = shalt.err (!%p577_p5)
}
 0x107   : > { %s581_s23 = scalar_lea.hbm %s763_s10, 512  ;;  %s585_s28 = scalar_lea.hbm %s818_s3, 1024 }
 0x108   : > { %p582_p6 = scmp.ne.s32.totalorder %s763_s10, %s581_s23  ;;  %p586_p10 = scmp.lt.s32.totalorder %s763_s10, %s818_s3 }
 0x109   : > { %p587_p11 = scmp.lt.s32.totalorder %s585_s28, %s581_s23 }
 0x10a   : > { %p583_p7 = pnand %p582_p6, %p709_p4 }
 0x10b   : > { %p588_p12 = por %p587_p11, %p586_p10 }
 0x10c   : > { %p584_p9 = pneg %p583_p7 }
 0x10e   : > { %p589_p13 = pnand %p588_p12, %p584_p9 }
 0x110   : > { %592 = shalt.err (!%p589_p13)
}
 0x111   : > { %s647_s4 = smov 128   ;;  %s648_s5 = smov 8  }
 0x112   : > { %491 = dma.vmem_to_hbm [thread:$0]  (%p709_p4), %s765_s6, 512, %s763_s10, %s770_s15, %s647_s4, %s647_s4, %s648_s5  }
 0x113 PF: > { %p497_p0 = scmp.ge.s32.totalorder %s643_s17, 2  ;;  %s385_s7 = sand.u32 1, %s623_s12  }
 0x114   : > { %s386_s8 = scalar_lea.sflag [#allocation3], %s385_s7 }
 0x115   : > { %p494_p1 = pnand %p497_p0, %p716_p8 }
 0x117   : > { %p495_p2 = pneg %p494_p1 }
 0x119   : > { %618 = dma.done.wait (%p495_p2), %s386_s8, 512  }
 0x11a   : > { %620 = vsyncadd (%p495_p2), %s386_s8, 4294966784  ;;  %s16_s17 = sadd.s32 1, %s643_s17   ;;  %s821_s12 = smov %s627_s13 }
 0x11b   : > { %p13_p3 = scmp.ge.s32.totalorder %s16_s17, 4   ;;  %s822_s13 = smov %s631_s14 }
 0x11c   : > { %s823_s14 = smov %s722_s25  ;;  %s824_s15 = smov %s639_s16 }
 0x11d   : > { %s825_s16 = smov %s827_s20  ;;  %15 = sbr.rel (!%p13_p3) target bundleno = 4 (0x4), region = 67 }
 0x122   :  { %391 = vsyncpa [#allocation3], 1 }
 0x123   :  { %393 = vsyncpa [#allocation3 + $0x1], 1 }

</bundles_post_ra>
